<compile_context>
chip_gen: v7x
topology: tpu7x:2x2x1
jax: 0.10.0
libtpu: 0.0.40
codegen_flags: <defaults>
</compile_context>

<pallas_src>
import jax
import jax.numpy as jnp
from jax.experimental import pallas as pl
from jax.experimental.pallas import tpu as pltpu


def _round_up(x: int, m: int) -> int:
    return ((x + m - 1) // m) * m


def _make_kernel(num_valid_rows: int, rows_per_tile: int, ragged: bool):
    """Build the per-tile kernel.

    pred_ref  : (2, rows_per_tile, 128)  native dtype
    label_ref : (3, rows_per_tile, 128)  native dtype
    loss_ref  : (8, 128) f32   lane-dense partial of sum(mask * smoothl1)
    mask_ref  : (8, 128) f32   lane-dense partial of sum(mask)
    """

    def kernel(pred_ref, label_ref, loss_ref, mask_ref):
        mask = label_ref[2].astype(jnp.float32)            # (rows, 128)

        # SmoothL1 (beta=1), branchless, summed over the 2 channels first so the
        # mask multiply happens only once per pixel.
        sl1_sum = None
        for c in range(2):
            d = jnp.abs(pred_ref[c].astype(jnp.float32)
                        - label_ref[c].astype(jnp.float32))
            m = jnp.minimum(d, 1.0)
            s = m * (d - 0.5 * m)
            sl1_sum = s if sl1_sum is None else sl1_sum + s

        masked_loss = sl1_sum * mask                        # (rows, 128)

        if ragged:
            # The last tile over-covers the row axis; Pallas does NOT zero-fill
            # out-of-bounds block reads, so zero out the garbage rows.
            row0 = pl.program_id(1) * rows_per_tile
            rows = row0 + jax.lax.broadcasted_iota(
                jnp.int32, (rows_per_tile, 128), 0)
            valid = rows < num_valid_rows
            masked_loss = jnp.where(valid, masked_loss, 0.0)
            mask = jnp.where(valid, mask, 0.0)

        # Collapse only the row-group axis (pure VPU vreg adds); keep the
        # (8, 128) lane-dense partial for the tiny JAX epilogue.
        ng = rows_per_tile // 8
        loss_ref[...] = jnp.sum(masked_loss.reshape(ng, 8, 128), axis=0)
        mask_ref[...] = jnp.sum(mask.reshape(ng, 8, 128), axis=0)

    return kernel


def offset_pos(offset_pred, offset_label, *, rows_per_tile: int = 2048):
    """Pallas equivalent of offset_pos.forward. Returns a scalar float32."""
    N, C_pred, H, W = offset_pred.shape
    assert C_pred == 2 and offset_label.shape == (N, 3, H, W)

    P = H * W
    if N == 0 or P == 0:
        # sum(...) == 0, denominator max(1, 0) == 1  ->  loss == 0
        return jnp.float32(0.0)

    # Flatten spatial dims (pure reshape, no data movement); keep native dtype.
    pred = offset_pred.reshape(N, 2, P)
    label = offset_label.reshape(N, 3, P)

    # Lane-dense layout: split the pixel axis into (rows, 128).
    R = pl.cdiv(P, 128)
    if R * 128 != P:
        # Rare for this model (its H*W maps are multiples of 128).  Zero pad
        # contributes 0 to both sums (mask == 0, diff == 0).
        pad = R * 128 - P
        pred = jnp.pad(pred, ((0, 0), (0, 0), (0, pad)))
        label = jnp.pad(label, ((0, 0), (0, 0), (0, pad)))
    pred = pred.reshape(N, 2, R, 128)
    label = label.reshape(N, 3, R, 128)

    # Tile the row axis.  Rows per tile must be a multiple of 8.
    rows = max(8, min(_round_up(R, 8), _round_up(rows_per_tile, 8)))
    if N == 1 and R > 8:
        # Keep both v7x TensorCores busy for single-image inputs.
        rows = min(rows, _round_up(pl.cdiv(R, 2), 8))
    T = pl.cdiv(R, rows)
    ragged = (T * rows != R)

    kernel = _make_kernel(R, rows, ragged)

    loss_part, mask_part = pl.pallas_call(
        kernel,
        out_shape=(
            jax.ShapeDtypeStruct((N, T, 8, 128), jnp.float32),
            jax.ShapeDtypeStruct((N, T, 8, 128), jnp.float32),
        ),
        grid=(N, T),
        in_specs=[
            pl.BlockSpec((None, 2, rows, 128), lambda n, t: (n, 0, t, 0)),
            pl.BlockSpec((None, 3, rows, 128), lambda n, t: (n, 0, t, 0)),
        ],
        out_specs=(
            pl.BlockSpec((None, None, 8, 128), lambda n, t: (n, t, 0, 0)),
            pl.BlockSpec((None, None, 8, 128), lambda n, t: (n, t, 0, 0)),
        ),
        compiler_params=pltpu.CompilerParams(
            dimension_semantics=("parallel", "parallel"),
            vmem_limit_bytes=32 * 1024 * 1024,
        ),
    )(pred, label)

    # Tiny final reduction + scalar epilogue in plain JAX.
    loss_sum = jnp.sum(loss_part)
    mask_sum = jnp.sum(mask_part)
    return 0.1 * loss_sum / jnp.maximum(1.0, mask_sum)


def _offset_pos_ref(offset_pred, offset_label):
    """Pure-JAX reference for correctness checking."""
    pred = offset_pred.astype(jnp.float32)
    label = offset_label.astype(jnp.float32)
    diff = pred - label[:, :2, :, :]
    adiff = jnp.abs(diff)
    sl1 = jnp.where(adiff < 1.0, 0.5 * diff * diff, adiff - 0.5)
    mask = label[:, 2, :, :][:, None, :, :]
    l1_loss = mask * sl1
    return 0.1 * jnp.sum(l1_loss) / jnp.maximum(1.0, jnp.sum(label[:, 2, :, :]))


def _make_inputs(key, N, H, W, dtype=jnp.float32):
    k_pred, k_off, k_mask = jax.random.split(key, 3)
    offset_pred = (jax.random.normal(k_pred, (N, 2, H, W), dtype=jnp.float32) * 2.0).astype(dtype)
    label_xy = jax.random.normal(k_off, (N, 2, H, W), dtype=jnp.float32) * 2.0
    label_mask = jax.random.bernoulli(k_mask, p=0.3, shape=(N, 1, H, W)).astype(jnp.float32)
    offset_label = jnp.concatenate([label_xy, label_mask], axis=1).astype(dtype)  # (N, 3, H, W)
    return offset_pred, offset_label


if __name__ == "__main__":
    key = jax.random.PRNGKey(0)
    k0, k1 = jax.random.split(key)

    # Main small test case (P = 256 -> 128-aligned, single ragged row-tile).
    offset_pred, offset_label = _make_inputs(k0, N=2, H=16, W=16)
    loss = jax.block_until_ready(offset_pos(offset_pred, offset_label))
    ref = _offset_pos_ref(offset_pred, offset_label)
    assert jnp.allclose(loss, ref, rtol=1e-5, atol=1e-6), (loss, ref)

    # Odd spatial size: exercises the P % 128 != 0 minimal-pad path + masking.
    pred2, label2 = _make_inputs(k1, N=1, H=7, W=20)
    loss2 = jax.block_until_ready(offset_pos(pred2, label2))
    ref2 = _offset_pos_ref(pred2, label2)
    assert jnp.allclose(loss2, ref2, rtol=1e-5, atol=1e-6), (loss2, ref2)

    print("KERNEL_OK")
</pallas_src>

<mosaic_0001>
module attributes {stable_mosaic.version = 11 : i64} {
  func.func @kernel(%arg0: i32, %arg1: i32, %arg2: memref<1x2x8x128xf32, #tpu.memory_space<vmem>>, %arg3: memref<1x3x8x128xf32, #tpu.memory_space<vmem>>, %arg4: memref<1x1x8x128xf32, #tpu.memory_space<vmem>>, %arg5: memref<1x1x8x128xf32, #tpu.memory_space<vmem>>) attributes {dimension_semantics = [#tpu.dimension_semantics<parallel>, #tpu.dimension_semantics<parallel>], iteration_bounds = array<i64: 2, 1>, scalar_prefetch = 0 : i64, scratch_operands = 0 : i64, tpu.core_type = #tpu.core_type<tc>, window_params = [{transform_indices = @transform_0, window_bounds = array<i64: 1, 2, 8, 128>}, {transform_indices = @transform_1, window_bounds = array<i64: 1, 3, 8, 128>}, {transform_indices = @transform_2, window_bounds = array<i64: 1, 1, 8, 128>}, {transform_indices = @transform_3, window_bounds = array<i64: 1, 1, 8, 128>}]} {
    %c0 = arith.constant 0 : index
    %c2 = arith.constant 2 : index
    %c0_0 = arith.constant 0 : index
    %c0_1 = arith.constant 0 : index
    %0 = vector.load %arg3[%c0, %c2, %c0_0, %c0_1] : memref<1x3x8x128xf32, #tpu.memory_space<vmem>>, vector<1x1x8x128xf32>
    %1 = vector.shape_cast %0 : vector<1x1x8x128xf32> to vector<8x128xf32>
    %c0_2 = arith.constant 0 : index
    %c0_3 = arith.constant 0 : index
    %c0_4 = arith.constant 0 : index
    %c0_5 = arith.constant 0 : index
    %2 = vector.load %arg2[%c0_2, %c0_3, %c0_4, %c0_5] : memref<1x2x8x128xf32, #tpu.memory_space<vmem>>, vector<1x1x8x128xf32>
    %3 = vector.shape_cast %2 : vector<1x1x8x128xf32> to vector<8x128xf32>
    %c0_6 = arith.constant 0 : index
    %c0_7 = arith.constant 0 : index
    %c0_8 = arith.constant 0 : index
    %c0_9 = arith.constant 0 : index
    %4 = vector.load %arg3[%c0_6, %c0_7, %c0_8, %c0_9] : memref<1x3x8x128xf32, #tpu.memory_space<vmem>>, vector<1x1x8x128xf32>
    %5 = vector.shape_cast %4 : vector<1x1x8x128xf32> to vector<8x128xf32>
    %6 = arith.subf %3, %5 : vector<8x128xf32>
    %7 = math.absf %6 : vector<8x128xf32>
    %cst = arith.constant 1.000000e+00 : f32
    %8 = vector.broadcast %cst : f32 to vector<8x128xf32>
    %9 = arith.minimumf %7, %8 : vector<8x128xf32>
    %cst_10 = arith.constant 5.000000e-01 : f32
    %10 = vector.broadcast %cst_10 : f32 to vector<8x128xf32>
    %11 = arith.mulf %10, %9 : vector<8x128xf32>
    %12 = arith.subf %7, %11 : vector<8x128xf32>
    %13 = arith.mulf %9, %12 : vector<8x128xf32>
    %c0_11 = arith.constant 0 : index
    %c1 = arith.constant 1 : index
    %c0_12 = arith.constant 0 : index
    %c0_13 = arith.constant 0 : index
    %14 = vector.load %arg2[%c0_11, %c1, %c0_12, %c0_13] : memref<1x2x8x128xf32, #tpu.memory_space<vmem>>, vector<1x1x8x128xf32>
    %15 = vector.shape_cast %14 : vector<1x1x8x128xf32> to vector<8x128xf32>
    %c0_14 = arith.constant 0 : index
    %c1_15 = arith.constant 1 : index
    %c0_16 = arith.constant 0 : index
    %c0_17 = arith.constant 0 : index
    %16 = vector.load %arg3[%c0_14, %c1_15, %c0_16, %c0_17] : memref<1x3x8x128xf32, #tpu.memory_space<vmem>>, vector<1x1x8x128xf32>
    %17 = vector.shape_cast %16 : vector<1x1x8x128xf32> to vector<8x128xf32>
    %18 = arith.subf %15, %17 : vector<8x128xf32>
    %19 = math.absf %18 : vector<8x128xf32>
    %cst_18 = arith.constant 1.000000e+00 : f32
    %20 = vector.broadcast %cst_18 : f32 to vector<8x128xf32>
    %21 = arith.minimumf %19, %20 : vector<8x128xf32>
    %cst_19 = arith.constant 5.000000e-01 : f32
    %22 = vector.broadcast %cst_19 : f32 to vector<8x128xf32>
    %23 = arith.mulf %22, %21 : vector<8x128xf32>
    %24 = arith.subf %19, %23 : vector<8x128xf32>
    %25 = arith.mulf %21, %24 : vector<8x128xf32>
    %26 = arith.addf %13, %25 : vector<8x128xf32>
    %27 = arith.mulf %26, %1 : vector<8x128xf32>
    %c8_i32 = arith.constant 8 : i32
    %28 = arith.muli %arg1, %c8_i32 : i32
    %29 = tpu.iota {dimensions = array<i32: 0>} : vector<8x128xi32>
    %30 = vector.broadcast %28 : i32 to vector<8x128xi32>
    %31 = arith.addi %30, %29 : vector<8x128xi32>
    %c2_i32 = arith.constant 2 : i32
    %32 = vector.broadcast %c2_i32 : i32 to vector<8x128xi32>
    %33 = arith.cmpi slt, %31, %32 : vector<8x128xi32>
    %cst_20 = arith.constant 0.000000e+00 : f32
    %34 = vector.broadcast %cst_20 : f32 to vector<8x128xf32>
    %35 = arith.select %33, %27, %34 : vector<8x128xi1>, vector<8x128xf32>
    %cst_21 = arith.constant 0.000000e+00 : f32
    %36 = vector.broadcast %cst_21 : f32 to vector<8x128xf32>
    %37 = arith.select %33, %1, %36 : vector<8x128xi1>, vector<8x128xf32>
    %38 = vector.shape_cast %35 : vector<8x128xf32> to vector<1x8x128xf32>
    %cst_22 = arith.constant dense<0.000000e+00> : vector<8x128xf32>
    %39 = vector.multi_reduction <add>, %38, %cst_22 [0] : vector<1x8x128xf32> to vector<8x128xf32>
    %c0_23 = arith.constant 0 : index
    %c0_24 = arith.constant 0 : index
    %c0_25 = arith.constant 0 : index
    %c0_26 = arith.constant 0 : index
    %40 = vector.load %arg4[%c0_23, %c0_24, %c0_25, %c0_26] : memref<1x1x8x128xf32, #tpu.memory_space<vmem>>, vector<1x1x8x128xf32>
    %41 = vector.shape_cast %40 : vector<1x1x8x128xf32> to vector<8x128xf32>
    %42 = vector.shape_cast %39 : vector<8x128xf32> to vector<1x1x8x128xf32>
    tpu.vector_store %arg4[%c0_23, %c0_24, %c0_25, %c0_26], %42 {strides = array<i32>} : memref<1x1x8x128xf32, #tpu.memory_space<vmem>>, vector<1x1x8x128xf32>,
    %43 = vector.shape_cast %37 : vector<8x128xf32> to vector<1x8x128xf32>
    %cst_27 = arith.constant dense<0.000000e+00> : vector<8x128xf32>
    %44 = vector.multi_reduction <add>, %43, %cst_27 [0] : vector<1x8x128xf32> to vector<8x128xf32>
    %c0_28 = arith.constant 0 : index
    %c0_29 = arith.constant 0 : index
    %c0_30 = arith.constant 0 : index
    %c0_31 = arith.constant 0 : index
    %45 = vector.load %arg5[%c0_28, %c0_29, %c0_30, %c0_31] : memref<1x1x8x128xf32, #tpu.memory_space<vmem>>, vector<1x1x8x128xf32>
    %46 = vector.shape_cast %45 : vector<1x1x8x128xf32> to vector<8x128xf32>
    %47 = vector.shape_cast %44 : vector<8x128xf32> to vector<1x1x8x128xf32>
    tpu.vector_store %arg5[%c0_28, %c0_29, %c0_30, %c0_31], %47 {strides = array<i32>} : memref<1x1x8x128xf32, #tpu.memory_space<vmem>>, vector<1x1x8x128xf32>,
    return
  }
  func.func @transform_0(%arg0: i32, %arg1: i32) -> (i32, i32, i32, i32) {
    %c0_i32 = arith.constant 0 : i32
    %c0_i32_0 = arith.constant 0 : i32
    %c0_i32_1 = arith.constant 0 : i32
    return %arg0, %c0_i32, %arg1, %c0_i32_0 : i32, i32, i32, i32
  }
  func.func @transform_1(%arg0: i32, %arg1: i32) -> (i32, i32, i32, i32) {
    %c0_i32 = arith.constant 0 : i32
    %c0_i32_0 = arith.constant 0 : i32
    %c0_i32_1 = arith.constant 0 : i32
    return %arg0, %c0_i32, %arg1, %c0_i32_0 : i32, i32, i32, i32
  }
  func.func @transform_2(%arg0: i32, %arg1: i32) -> (i32, i32, i32, i32) {
    %c0_i32 = arith.constant 0 : i32
    %c0_i32_0 = arith.constant 0 : i32
    %c0_i32_1 = arith.constant 0 : i32
    return %arg0, %arg1, %c0_i32, %c0_i32_0 : i32, i32, i32, i32
  }
  func.func @transform_3(%arg0: i32, %arg1: i32) -> (i32, i32, i32, i32) {
    %c0_i32 = arith.constant 0 : i32
    %c0_i32_0 = arith.constant 0 : i32
    %c0_i32_1 = arith.constant 0 : i32
    return %arg0, %arg1, %c0_i32, %c0_i32_0 : i32, i32, i32, i32
  }
}

</mosaic_0001>

<bundles_post_ra>
// kernel: tpu_custom_call.1
= control target key start
LH: loop header
LB: loop body
LE: loop exit
PB: predicated region body
PF: predicated region fallthrough
CT: control target
= control target key end

     0   :  { %9 = vsyncpa [#allocation3], 0  ;;  %s981_s0 = inlined_call_operand.hbm [shape: f32[2,2,2,128], index: 0, kind: input, shape index: {}]   ;;  %s982_s1 = inlined_call_operand.hbm [shape: f32[2,3,2,128], index: 1, kind: input, shape index: {}]   ;;  %s983_s2 = inlined_call_operand.hbm [shape: f32[2,1,8,128], index: 2, kind: output, shape index: {0}]   ;;  %s984_s3 = inlined_call_operand.hbm [shape: f32[2,1,8,128], index: 3, kind: output, shape index: {1}]  }
   0x1   :  { %11 = vsyncpa [#allocation3 + $0x1], 0 }
   0x2   :  { %12 = vsyncpa [#allocation6], 0 }
   0x3   :  { %14 = vsyncpa [#allocation6 + $0x1], 0 }
   0x4   :  { %15 = vsyncpa [#allocation4], 0 }
   0x5   :  { %17 = vsyncpa [#allocation4 + $0x1], 0 }
   0x6   :  { %18 = vsyncpa [#allocation9], 0 }
   0x7   :  { %20 = vsyncpa [#allocation9 + $0x1], 0  ;;  %s792_s12 = smov 0   ;;  %s794_s13 = smov 0  }
   0x8   :  { %s796_s14 = smov 0   ;;  %s798_s15 = smov 0  }
   0x9   :  { %s800_s16 = smov 0   ;;  %s802_s17 = smov 0  }
   0xa LB: > { %s539_s18 = sadd.s32 4294967295, %s758_s17   ;;  %s540_s19 = sadd.s32 4294967294, %s758_s17   ;;  %s758_s17 = sphi %s802_s17, %s26_s17   ;;  %s754_s16 = sphi %s800_s16, %s993_s16   ;;  %s750_s15 = sphi %s798_s15, %s992_s15   ;;  %s746_s14 = sphi %s796_s14, %s991_s14   ;;  %s742_s13 = sphi %s794_s13, %s990_s13   ;;  %s738_s12 = sphi %s792_s12, %s989_s12  }
   0xb   : > { %s38_s20 = sadd.s32 1, %s754_s16  ;;  %s47_s21 = sadd.s32 1, %s746_s14 }
   0xc   : > { %p40_p0 = scmp.ge.s32.totalorder %s38_s20, 2  ;;  %p54_p1 = scmp.ne.s32.totalorder %s746_s14, %s742_s13 }
   0xd   : > { %p55_p2 = scmp.eq.s32.totalorder %s758_s17, 0  ;;  %p60_p3 = scmp.ne.s32.totalorder %s742_s13, %s738_s12 }
   0xe   : > { %s995_s20 = smov (%p40_p0, %s38_s20), 0  ;;  %p61_p5 = scmp.eq.s32.totalorder %s539_s18, 0 }
   0xf   : > { %p833_p4 = por %p55_p2, %p54_p1  ;;  %s42_s23 = ssub.s32 %s754_s16, %s995_s20 }
  0x10   : > { %p114_p6 = scmp.eq.s32.totalorder %s539_s18, 1  ;;  %p45_p7 = scmp.eq.s32.totalorder %s42_s23, 0 }
  0x11   : > { %p839_p8 = por %p61_p5, %p60_p3  ;;  %p120_p10 = scmp.eq.s32.totalorder %s540_s19, 1 }
  0x12   : > { %p843_p9 = por %p114_p6, %p54_p1  ;;  %p542_p12 = scmp.ge.s32.totalorder %s758_s17, 2 }
  0x13   : > { %s848_s26 = scalar_select %p45_p7, %s746_s14, %s47_s21  }
  0x14   : > { %p850_p11 = por %p120_p10, %p60_p3  ;;  %164 = sbr.rel (%p542_p12) target bundleno = 68 (0x44), region = 16 }
  0x1b   : > { %167 = sbr.rel (!%p833_p4) target bundleno = 47 (0x2f), region = 20 }
  0x22   : > { %s168_s28 = sand.u32 1, %s746_s14  }
  0x23   : > { %s543_s29 = sshll.u32 %s168_s28, 4  ;;  %s169_s30 = scalar_lea.sflag [#allocation3], %s168_s28 }
  0x24   : > { %s172_s4 = scalar_lea.vmem [#allocation2], %s543_s29 }
  0x25   : > { %178 = vsyncadd %s169_s30, 192  ;;  %s564_s5 = sshll.u32 %s754_s16, 6  ;;  %s190_s6 = sld [smem:[#allocation0]]  }
  0x26   : > { %s183_s9 = scalar_lea.hbm %s981_s0, %s564_s5  ;;  %s198_s10 = sshll.u32 %s172_s4, 4  ;;  %s199_s10 = int_to_ptr.vmem [resolvable:$true] %s198_s10 }
  0x27   : > { %s760_s11 = smov 32   ;;  %s761_s18 = smov 128  }
  0x28   : > { %205 = sst [smem:[#allocation11]] %s760_s11  ;;  %s762_s19 = smov 1  }
  0x29   : > { %207 = sst [smem:[#allocation11 + $0x1]] %s761_s18  ;;  %s763_s28 = smov 2  }
  0x2a   : > { %209 = sst [smem:[#allocation11 + $0x2]] %s762_s19  ;;  %s764_s29 = smov [#allocation10]  }
  0x2b   : > { %s546_s21 = sshll.u32 %s190_s6, 26  ;;  %211 = sst [smem:[#allocation11 + $0x3]] %s760_s11 }
  0x2c   : > { %s547_s23 = sadd.s32 134217728, %s546_s21  ;;  %213 = sst [smem:[#allocation11 + $0x4]] %s760_s11 }
  0x2d   : > { %215 = sst [smem:[#allocation11 + $0x5]] %s763_s28 }
  0x2e   : > { %217 = dma.general %s183_s9, 64, %s199_s10, %s169_s30, %s764_s29, [#allocation11], %s547_s23, 0  }
  0x2f PF: > { %220 = sbr.rel (!%p833_p4) target bundleno = 68 (0x44), region = 24 }
  0x36   : > { %s221_s4 = sand.u32 1, %s746_s14  }
  0x37   : > { %s565_s5 = smul.u32 24, %s221_s4  ;;  %s222_s7 = scalar_lea.sflag [#allocation6], %s221_s4 }
  0x39   : > { %s225_s8 = scalar_lea.vmem [#allocation5], %s565_s5 }
  0x3a   : > { %231 = vsyncadd %s222_s7, 288  ;;  %s566_s18 = smul.u32 96, %s754_s16  ;;  %s243_s6 = sld [smem:[#allocation0]]  }
  0x3b   : > { %s251_s19 = sshll.u32 %s225_s8, 4  ;;  %s765_s30 = smov 32   ;;  %s252_s19 = int_to_ptr.vmem [resolvable:$true] %s251_s19 }
  0x3c   : > { %s236_s28 = scalar_lea.hbm %s982_s1, %s566_s18  ;;  %258 = sst [smem:[#allocation13]] %s765_s30 }
  0x3d   : > { %s766_s9 = smov 128   ;;  %s767_s22 = smov 1  }
  0x3e   : > { %260 = sst [smem:[#allocation13 + $0x1]] %s766_s9  ;;  %s768_s29 = smov 2  }
  0x3f   : > { %262 = sst [smem:[#allocation13 + $0x2]] %s767_s22  ;;  %s769_s4 = smov [#allocation12]  }
  0x40   : > { %s549_s10 = sshll.u32 %s243_s6, 26  ;;  %264 = sst [smem:[#allocation13 + $0x3]] %s765_s30 }
  0x41   : > { %s550_s23 = sadd.s32 134217728, %s549_s10  ;;  %266 = sst [smem:[#allocation13 + $0x4]] %s765_s30 }
  0x42   : > { %268 = sst [smem:[#allocation13 + $0x5]] %s768_s29 }
  0x43   : > { %270 = dma.general %s236_s28, 96, %s252_s19, %s222_s7, %s769_s4, [#allocation13], %s550_s23, 0  }
  0x44 PF: > { %p551_p13 = scmp.ge.s32.totalorder %s758_s17, 1  ;;  %p272_p0 = scmp.lt.s32.totalorder %s758_s17, 3 }
  0x46   : > { %p273_p1 = pnand %p551_p13, %p272_p0 }
  0x47   : > { %s874_s5 = sand.u32 (!%p273_p1), 1, %s742_s13  }
  0x48   : > { %276 = sbr.rel (%p273_p1) target bundleno = 137 (0x89), region = 28  ;;  %s552_s8 = sshll.u32 (!%p273_p1), %s874_s5, 4 }
  0x49   : > { %s279_s18 = scalar_lea.sflag (!%p273_p1), [#allocation3], %s874_s5  ;;  %s282_s6 = scalar_lea.vmem (!%p273_p1), [#allocation2], %s552_s8 }
  0x4f   : > { %721 = dma.done.wait (%p839_p8), %s279_s18, 256  }
  0x50   : > { %723 = vsyncadd (%p839_p8), %s279_s18, 4294967040  ;;  %s567_s7 = smul.u32 24, %s874_s5  ;;  %s288_s19 = scalar_lea.sflag [#allocation6], %s874_s5 }
  0x52   : > { %s291_s21 = scalar_lea.vmem [#allocation5], %s567_s7 }
  0x53   : > { %725 = dma.done.wait (%p839_p8), %s288_s19, 384  }
  0x54   : > { %727 = vsyncadd (%p839_p8), %s288_s19, 4294966912  ;;  %s553_s11 = sshll.u32 %s874_s5, 3  ;;  %v353_v0 = vlaneseq  ;;  %s560_s9 = sshll.u32 %s750_s15, 7  ;;  %v555_v2 = vld [vmem:[%s291_s21 + $0x10] sm:$0xff]  ;;  %v332_v3 = vld [vmem:[%s282_s6] sm:$0xff] }
  0x55   : > { %s323_s28 = scalar_lea.vmem [#allocation8], %s553_s11  ;;  %v333_v4 = vld [vmem:[%s291_s21] sm:$0xff]  ;;  %s899_s10 = scalar_lea.hbm %s984_s3, %s560_s9  ;;  %v557_v7 = vld [vmem:[%s291_s21 + $0x8] sm:$0xff] }
  0x56   : > { %v354_v1 = vshrl.u32 %v353_v0, 7  ;;  %s398_s30 = sshll.u32 %s323_s28, 4  ;;  %v334_v5 = vsub.f32 %v332_v3, %v333_v4  ;;  %v556_v6 = vld [vmem:[%s282_s6 + $0x8] sm:$0xff]  ;;  %s370_s23 = scalar_lea.sflag [#allocation9], %s874_s5  ;;  %s892_s30 = int_to_ptr.vmem [resolvable:$true] %s398_s30 }
  0x57   : > { %v344_v9 = vsub.f32 %v556_v6, %v557_v7  ;;  %s640_s29 = scalar_lea.vmem %s892_s30, 128  ;;  %s770_s4 = smov [#allocation8]  }
  0x58   : > { %vm357_vm0 = vcmp.lt.s32.totalorder %v354_v1, 2  ;;  %v335_v10 = vand.u32 2147483647, %v334_v5  ;;  %p641_p2 = scmp.ne.s32.totalorder %s892_s30, %s640_s29  ;;  %s644_s8 = sshll.u32 %s770_s4, 4  ;;  %s645_s8 = int_to_ptr.vmem [resolvable:$false] %s644_s8 }
  0x59   : > { %v359_v8 = vsel %vm357_vm0, %v555_v2, 0.0  ;;  %s646_s18 = scalar_lea.vmem %s645_s8, 256  ;;  %p647_p5 = scmp.lt.s32.totalorder %s892_s30, %s645_s8 }
  0x5a   : > { %363 = vst [vmem:[%s323_s28] sm:$0xff] %v359_v8  ;;  %p642_p3 = pnand %p641_p2, %p843_p9  ;;  %p648_p6 = scmp.lt.s32.totalorder %s646_s18, %s640_s29 }
  0x5c   : > { %p643_p4 = pneg %p642_p3  ;;  %p649_p7 = por %p648_p6, %p647_p5 }
  0x5e   : > { %p650_p8 = pnand %p649_p7, %p643_p4 }
  0x60   : > { %653 = shalt.err (!%p650_p8)
}
  0x61   : > { %s654_s6 = scalar_lea.hbm %s899_s10, 128  ;;  %s658_s21 = scalar_lea.hbm %s984_s3, 256 }
  0x62   : > { %p655_p10 = scmp.ne.s32.totalorder %s899_s10, %s654_s6  ;;  %p659_p1 = scmp.lt.u32.totalorder %s899_s10, %s984_s3 }
  0x63   : > { %p660_p2 = scmp.lt.u32.totalorder %s658_s21, %s654_s6  ;;  %p662_p4 = scmp.lt.u32.totalorder %s654_s6, %s899_s10 }
  0x64   : > { %p656_p13 = pnand %p655_p10, %p843_p9 }
  0x65   : > { %p661_p3 = por %p660_p2, %p659_p1 }
  0x66   : > { %p657_p0 = pneg %p656_p13 }
  0x67   : > { %p663_p5 = por %p662_p4, %p661_p3 }
  0x69   : > { %p664_p6 = pnand %p663_p5, %p657_p0 }
  0x6b   : > { %667 = shalt.err (!%p664_p6)
}
  0x6c   : > { %571 = dma.vmem_to_hbm [thread:$0]  (%p843_p9), %s892_s30, 128, %s899_s10, %s370_s23   ;;  %v345_v11 = vand.u32 2147483647, %v344_v9  ;;  %v336_v12 = vmin.f32 %v335_v10, 1.0 }
  0x6d   : > { %s316_s22 = scalar_lea.vmem [#allocation7], %s553_s11  ;;  %s933_s23 = scalar_lea.hbm %s983_s2, %s560_s9 }
  0x6e   : > { %v346_v13 = vmin.f32 %v345_v11, 1.0  ;;  %v337_v14 = vmul.f32 0.5, %v336_v12  ;;  %s384_s29 = sshll.u32 %s316_s22, 4  ;;  %s365_s4 = scalar_lea.sflag [#allocation4], %s874_s5  ;;  %s926_s29 = int_to_ptr.vmem [resolvable:$true] %s384_s29 }
  0x6f   : > { %s668_s8 = scalar_lea.vmem %s926_s29, 128  ;;  %s771_s11 = smov [#allocation7]  }
  0x70   : > { %v347_v15 = vmul.f32 0.5, %v346_v13  ;;  %v338_v16 = vsub.f32 %v335_v10, %v337_v14  ;;  %p669_p7 = scmp.ne.s32.totalorder %s926_s29, %s668_s8  ;;  %s672_s18 = sshll.u32 %s771_s11, 4  ;;  %s673_s18 = int_to_ptr.vmem [resolvable:$false] %s672_s18 }
  0x71   : > { %s674_s15 = scalar_lea.vmem %s673_s18, 256  ;;  %p675_p13 = scmp.lt.s32.totalorder %s926_s29, %s673_s18 }
  0x72   : > { %v348_v17 = vsub.f32 %v345_v11, %v347_v15  ;;  %v339_v18 = vmul.f32 %v338_v16, %v336_v12  ;;  %p670_p8 = pnand %p669_p7, %p843_p9  ;;  %p676_p0 = scmp.lt.s32.totalorder %s674_s15, %s668_s8 }
  0x74   : > { %v349_v19 = vmul.f32 %v348_v17, %v346_v13  ;;  %p671_p10 = pneg %p670_p8  ;;  %p677_p1 = por %p676_p0, %p675_p13 }
  0x76   : > { %v350_v20 = vadd.f32 %v349_v19, %v339_v18  ;;  %p678_p2 = pnand %p677_p1, %p671_p10 }
  0x78   : > { %v351_v21 = vmul.f32 %v555_v2, %v350_v20 }
  0x7a   : > { %v358_v22 = vsel %vm357_vm0, %v351_v21, 0.0 }
  0x7b   : > { %361 = vst [vmem:[%s316_s22] sm:$0xff] %v358_v22 }
  0x7c   : > { %681 = shalt.err (!%p678_p2)
}
  0x7d   : > { %s682_s5 = scalar_lea.hbm %s933_s23, 128  ;;  %s686_s7 = scalar_lea.hbm %s983_s2, 256 }
  0x7e   : > { %p683_p3 = scmp.ne.s32.totalorder %s933_s23, %s682_s5  ;;  %p687_p6 = scmp.lt.u32.totalorder %s933_s23, %s983_s2 }
  0x7f   : > { %p688_p7 = scmp.lt.u32.totalorder %s686_s7, %s682_s5  ;;  %p690_p10 = scmp.lt.u32.totalorder %s682_s5, %s933_s23 }
  0x80   : > { %p684_p4 = pnand %p683_p3, %p843_p9 }
  0x81   : > { %p689_p8 = por %p688_p7, %p687_p6 }
  0x82   : > { %p685_p5 = pneg %p684_p4 }
  0x83   : > { %p691_p13 = por %p690_p10, %p689_p8 }
  0x85   : > { %p692_p0 = pnand %p691_p13, %p685_p5 }
  0x87   : > { %695 = shalt.err (!%p692_p0)
}
  0x88   : > { %570 = dma.vmem_to_hbm [thread:$0]  (%p843_p9), %s926_s29, 128, %s933_s23, %s365_s4  }
  0x89 PF: > { %s410_s28 = sand.u32 1, %s738_s12   ;;  %p575_p1 = pnand %p542_p12, %p850_p11 }
  0x8a   : > { %s411_s24 = scalar_lea.sflag [#allocation4], %s410_s28 }
  0x8b   : > { %729 = dma.done.wait (!%p575_p1), %s411_s24, 128  }
  0x8c   : > { %731 = vsyncadd (!%p575_p1), %s411_s24, 4294967168  ;;  %s420_s22 = scalar_lea.sflag [#allocation9], %s410_s28 }
  0x8d   : > { %733 = dma.done.wait (!%p575_p1), %s420_s22, 128  }
  0x8e   : > { %735 = vsyncadd (!%p575_p1), %s420_s22, 4294967168  ;;  %s26_s17 = sadd.s32 1, %s758_s17   ;;  %s989_s12 = smov %s742_s13 }
  0x8f   : > { %p23_p2 = scmp.ge.s32.totalorder %s26_s17, 4   ;;  %s990_s13 = smov %s746_s14 }
  0x90   : > { %s991_s14 = smov %s848_s26  ;;  %s992_s15 = smov %s754_s16 }
  0x91   : > { %s993_s16 = smov %s995_s20  ;;  %25 = sbr.rel (!%p23_p2) target bundleno = 10 (0xa), region = 116 }
  0x98   :  { %425 = vsyncpa [#allocation3], 1 }
  0x99   :  { %427 = vsyncpa [#allocation3 + $0x1], 1 }
  0x9a   :  { %428 = vsyncpa [#allocation6], 1 }
  0x9b   :  { %430 = vsyncpa [#allocation6 + $0x1], 1 }
  0x9c   :  { %431 = vsyncpa [#allocation4], 1 }
  0x9d   :  { %433 = vsyncpa [#allocation4 + $0x1], 1 }
  0x9e   :  { %434 = vsyncpa [#allocation9], 1 }
  0x9f   :  { %436 = vsyncpa [#allocation9 + $0x1], 1 }

</bundles_post_ra>
